<compile_context>
chip_gen: v5e
topology: v5e:2x2
jax: 0.10.0
libtpu: 0.0.40
codegen_flags: <defaults>
</compile_context>

<pallas_src>
import jax
import jax.numpy as jnp
from jax.experimental import pallas as pl
from jax.experimental.pallas import tpu as pltpu

_LANE = 128
_MAX_LANE_WIDTH = 8192                    # widest slab last-dim we reshape to
_TARGET_BLOCK_BYTES = 4 * 1024 * 1024     # ~4 MiB f32 tiles per grid step
_MIN_GRID_STEPS = 4                       # keep both v7x TCs busy + pipeline
_SMALL_BYPASS_ELEMS = 64 * 1024           # below this, plain jnp is faster


def _bright_contrast_kernel(params_ref, x_ref, o_ref):
    # params_ref (SMEM): [alpha, beta, lo, hi]
    alpha = params_ref[0]
    beta = params_ref[1]
    lo = params_ref[2]
    hi = params_ref[3]
    x = x_ref[...]
    # Fused multiply-add + clip. The Bernoulli gate is folded into the scalars
    # (alpha=1, beta=0, lo=-inf, hi=+inf on the pass-through path), so out == x
    # exactly when the augmentation did not fire, even for inputs outside [0,1].
    o_ref[...] = jnp.minimum(jnp.maximum(x * alpha + beta, lo), hi)


def _choose_lane_width(total):
    """Largest multiple of 128 that divides `total`, capped at _MAX_LANE_WIDTH."""
    best = _LANE
    lane = _LANE
    while lane <= _MAX_LANE_WIDTH:
        if total % lane == 0:
            best = lane
        lane += _LANE
    return best


def _apply_bright_contrast(img_2d, params):
    """img_2d: [R, L] float32 slab (L a multiple of 128); params: [4] f32 (SMEM)."""
    rows, lanes = img_2d.shape
    row_bytes = lanes * 4

    # ~4 MiB per block; Pallas double-buffers input and output tiles, so the
    # resident footprint is ~4x the block size (~16 MiB) — safe on v7x's 64 MiB
    # VMEM under the 32 MiB scoped limit and trivially on v5e/v6e.
    block_rows = max(8, _TARGET_BLOCK_BYTES // row_bytes)
    # Guarantee multiple grid steps (when rows allow) so both v7x TensorCores
    # get work and input-DMA / VPU / writeback overlap even on mid-size images.
    block_rows = min(block_rows, max(8, rows // _MIN_GRID_STEPS))
    block_rows = max(8, (block_rows // 8) * 8)    # (8,128) tiling constraint
    block_rows = min(block_rows, rows)
    grid = (pl.cdiv(rows, block_rows),)

    n = rows * lanes
    cost = pl.CostEstimate(
        flops=4 * n,                 # mul + add + max + min per element
        transcendentals=0,
        bytes_accessed=2 * n * 4,    # one read + one write of the image
    )

    return pl.pallas_call(
        _bright_contrast_kernel,
        out_shape=jax.ShapeDtypeStruct(img_2d.shape, img_2d.dtype),
        grid=grid,
        in_specs=[
            pl.BlockSpec(memory_space=pltpu.MemorySpace.SMEM),    # scalar params
            pl.BlockSpec((block_rows, lanes), lambda i: (i, 0)),  # image tile
        ],
        out_specs=pl.BlockSpec((block_rows, lanes), lambda i: (i, 0)),
        compiler_params=pltpu.CompilerParams(
            # Shard tiles across both TensorCores on v7x; no-op on v5e/v6e.
            dimension_semantics=("parallel",),
            # Headroom-safe on 64 MiB (v7x) and 128 MiB (v5e/v6e) parts alike.
            vmem_limit_bytes=32 * 1024 * 1024,
        ),
        cost_estimate=cost,
    )(params, img_2d)


class RandomBrightContrast:
    """JAX/Pallas port of randomBrightContrast."""

    def __init__(self, p=0.5, bright_limit=1.0, contrast_limit=1.0):
        self.p = p
        self.bright_limit = bright_limit
        self.contrast_limit = contrast_limit

    def __call__(self, key, img, label=None):
        # ---- glue: sample the random augmentation parameters in plain JAX ----
        k_gate, k_alpha, k_beta = jax.random.split(key, 3)
        applied = jax.random.uniform(k_gate, ()) < self.p
        alpha = 1.0 + jax.random.uniform(
            k_alpha, (), minval=-self.contrast_limit, maxval=self.contrast_limit
        )
        beta = jax.random.uniform(
            k_beta, (), minval=-self.bright_limit, maxval=self.bright_limit
        )  # brightness_by_max with max_value = 1.0 for float images

        if img.dtype != jnp.float32:
            # TODO(synk): non-f32 images take a fused jnp fallback (promote to
            # f32, apply, cast back) instead of the f32-only Pallas kernel.
            xf = img.astype(jnp.float32)
            out = jnp.where(applied, jnp.clip(xf * alpha + beta, 0.0, 1.0), xf)
            return out.astype(img.dtype), label

        total = 1
        for d in img.shape:
            total *= d

        if total < _SMALL_BYPASS_ELEMS:
            # Small-input bypass: custom-call launch + grid setup dominates at
            # this size and XLA fuses the FMA+clip+select into one pass anyway.
            out = jnp.where(applied, jnp.clip(img * alpha + beta, 0.0, 1.0), img)
            return out, label

        # Fold the Bernoulli gate into the scalars so the kernel is a pure
        # FMA + clip with no per-element select.
        alpha_k = jnp.where(applied, alpha, 1.0)
        beta_k = jnp.where(applied, beta, 0.0)
        lo = jnp.where(applied, 0.0, -jnp.inf)
        hi = jnp.where(applied, 1.0, jnp.inf)
        params = jnp.stack([alpha_k, beta_k, lo, hi]).astype(jnp.float32)

        # ---- glue: flatten to a lane-dense 2-D slab for the kernel ----
        orig_shape = img.shape
        flat = img.reshape(-1)
        main = (total // _LANE) * _LANE
        lanes = _choose_lane_width(main)
        main_flat = flat if main == total else flat[:main]
        img_2d = main_flat.reshape(main // lanes, lanes)

        out_2d = _apply_bright_contrast(img_2d, params)
        out_main = out_2d.reshape(-1)

        if main == total:
            out = out_main.reshape(orig_shape)
        else:
            # <=127-element tail handled in plain jnp; avoids full-image
            # pad + slice round-trips for sizes not divisible by 128.
            tail = flat[main:]
            tail_out = jnp.minimum(jnp.maximum(tail * alpha_k + beta_k, lo), hi)
            out = jnp.concatenate([out_main, tail_out]).reshape(orig_shape)
        return out, label


def _reference(key, img, p, bright_limit, contrast_limit):
    """Pure-JAX reference with the same parameter derivation as the wrapper."""
    k_gate, k_alpha, k_beta = jax.random.split(key, 3)
    applied = jax.random.uniform(k_gate, ()) < p
    alpha = 1.0 + jax.random.uniform(
        k_alpha, (), minval=-contrast_limit, maxval=contrast_limit
    )
    beta = jax.random.uniform(k_beta, (), minval=-bright_limit, maxval=bright_limit)
    return jnp.where(applied, jnp.clip(img * alpha + beta, 0.0, 1.0), img)


if __name__ == "__main__":
    key = jax.random.PRNGKey(0)
    k_img_small, k_img_big, k_aug1, k_aug2, k_aug3 = jax.random.split(key, 5)

    # ---- small NCHW batch (bypass path), values in [0, 1] like a float image
    aug = RandomBrightContrast(p=0.5, bright_limit=1.0, contrast_limit=1.0)
    x_small = jax.random.uniform(k_img_small, (2, 4, 16, 16), dtype=jnp.float32)
    out_small, label = aug(k_aug1, x_small, label=None)
    out_small = jax.block_until_ready(out_small)
    assert out_small.shape == x_small.shape and out_small.dtype == x_small.dtype
    assert label is None
    ref_small = _reference(k_aug1, x_small, 0.5, 1.0, 1.0)
    assert bool(jnp.allclose(out_small, ref_small, atol=1e-6))

    # ---- larger image: exercises the Pallas kernel (multi-step grid)
    x_big = jax.random.uniform(k_img_big, (2, 4, 128, 128), dtype=jnp.float32)

    # p=1.0 -> augmentation always fires: output must be clipped & match ref
    aug_on = RandomBrightContrast(p=1.0, bright_limit=1.0, contrast_limit=1.0)
    out_on, _ = aug_on(k_aug2, x_big, label=None)
    out_on = jax.block_until_ready(out_on)
    assert out_on.shape == x_big.shape and out_on.dtype == x_big.dtype
    assert bool(jnp.all(out_on >= 0.0)) and bool(jnp.all(out_on <= 1.0))
    ref_on = _reference(k_aug2, x_big, 1.0, 1.0, 1.0)
    assert bool(jnp.allclose(out_on, ref_on, atol=1e-6)), "mismatch vs. reference"

    # p=0.0 -> never fires: exact pass-through (gate folded into +/-inf bounds)
    aug_off = RandomBrightContrast(p=0.0, bright_limit=1.0, contrast_limit=1.0)
    out_off, _ = aug_off(k_aug3, x_big, label=None)
    out_off = jax.block_until_ready(out_off)
    assert bool(jnp.array_equal(out_off, x_big)), "pass-through not exact"

    print("KERNEL_OK")
</pallas_src>

<mosaic_0001>
module attributes {stable_mosaic.version = 11 : i64} {
  func.func @_bright_contrast_kernel(%arg0: i32, %arg1: memref<4xf32, #tpu.memory_space<smem>>, %arg2: memref<8x8192xf32, #tpu.memory_space<vmem>>, %arg3: memref<8x8192xf32, #tpu.memory_space<vmem>>) attributes {dimension_semantics = [#tpu.dimension_semantics<parallel>], iteration_bounds = array<i64: 2>, scalar_prefetch = 0 : i64, scratch_operands = 0 : i64, tpu.core_type = #tpu.core_type<tc>, window_params = [{transform_indices = @transform_0, window_bounds = array<i64: 4>}, {transform_indices = @transform_1, window_bounds = array<i64: 8, 8192>}, {transform_indices = @transform_2, window_bounds = array<i64: 8, 8192>}]} {
    %c0 = arith.constant 0 : index
    %0 = memref.load %arg1[%c0] : memref<4xf32, #tpu.memory_space<smem>>
    %c1 = arith.constant 1 : index
    %1 = memref.load %arg1[%c1] : memref<4xf32, #tpu.memory_space<smem>>
    %c2 = arith.constant 2 : index
    %2 = memref.load %arg1[%c2] : memref<4xf32, #tpu.memory_space<smem>>
    %c3 = arith.constant 3 : index
    %3 = memref.load %arg1[%c3] : memref<4xf32, #tpu.memory_space<smem>>
    %c0_0 = arith.constant 0 : index
    %c0_1 = arith.constant 0 : index
    %4 = vector.load %arg2[%c0_0, %c0_1] : memref<8x8192xf32, #tpu.memory_space<vmem>>, vector<8x8192xf32>
    %5 = vector.broadcast %0 : f32 to vector<8x8192xf32>
    %6 = arith.mulf %4, %5 : vector<8x8192xf32>
    %7 = vector.broadcast %1 : f32 to vector<8x8192xf32>
    %8 = arith.addf %6, %7 : vector<8x8192xf32>
    %9 = vector.broadcast %2 : f32 to vector<8x8192xf32>
    %10 = arith.maximumf %8, %9 : vector<8x8192xf32>
    %11 = vector.broadcast %3 : f32 to vector<8x8192xf32>
    %12 = arith.minimumf %10, %11 : vector<8x8192xf32>
    %c0_2 = arith.constant 0 : index
    %c0_3 = arith.constant 0 : index
    %13 = vector.load %arg3[%c0_2, %c0_3] : memref<8x8192xf32, #tpu.memory_space<vmem>>, vector<8x8192xf32>
    tpu.vector_store %arg3[%c0_2, %c0_3], %12 {strides = array<i32>} : memref<8x8192xf32, #tpu.memory_space<vmem>>, vector<8x8192xf32>,
    return
  }
  func.func @transform_0(%arg0: i32) -> i32 {
    %c0_i32 = arith.constant 0 : i32
    %c0_i32_0 = arith.constant 0 : i32
    return %c0_i32 : i32
  }
  func.func @transform_1(%arg0: i32) -> (i32, i32) {
    %c0_i32 = arith.constant 0 : i32
    %c0_i32_0 = arith.constant 0 : i32
    return %arg0, %c0_i32 : i32, i32
  }
  func.func @transform_2(%arg0: i32) -> (i32, i32) {
    %c0_i32 = arith.constant 0 : i32
    %c0_i32_0 = arith.constant 0 : i32
    return %arg0, %c0_i32 : i32, i32
  }
}

</mosaic_0001>

<bundles_post_ra>
// kernel: tpu_custom_call.1
= control target key start
LH: loop header
LB: loop body
LE: loop exit
PB: predicated region body
PF: predicated region fallthrough
CT: control target
= control target key end

     0   :  { %7 = vsyncpa [#allocation5], 0  ;;  %s1417_s0 = inlined_call_operand.hbm [shape: f32[4], index: 0, kind: input, shape index: {}]   ;;  %s1418_s1 = inlined_call_operand.hbm [shape: f32[16,8192], index: 1, kind: input, shape index: {}]   ;;  %s1419_s2 = inlined_call_operand.hbm [shape: f32[16,8192], index: 2, kind: output, shape index: {}]  }
   0x1   :  { %8 = vsyncpa [#allocation3], 0 }
   0x2   :  { %10 = vsyncpa [#allocation3 + $0x1], 0 }
   0x3   :  { %11 = vsyncpa [#allocation4], 0 }
   0x4   :  { %13 = vsyncpa [#allocation4 + $0x1], 0  ;;  %s878_s9 = smov 0   ;;  %s880_s10 = smov 0  }
   0x5   :  { %s882_s11 = smov 0   ;;  %s884_s12 = smov 0  }
   0x6 LB: > { %s899_s13 = sadd.s32 4294967295, %s860_s12   ;;  %s667_s14 = sadd.s32 4294967294, %s860_s12   ;;  %s860_s12 = sphi %s884_s12, %s1429_s12   ;;  %s856_s11 = sphi %s882_s11, %s1428_s11   ;;  %s852_s10 = sphi %s880_s10, %s1427_s10   ;;  %s848_s9 = sphi %s878_s9, %s1426_s9  }
   0x7   : > { %p60_p0 = scmp.ne.s32.totalorder %s852_s10, %s848_s9  ;;  %p61_p1 = scmp.eq.s32.totalorder %s899_s13, 0 }
   0x8   : > { %p84_p2 = scmp.eq.s32.totalorder %s899_s13, 1  ;;  %p90_p3 = scmp.eq.s32.totalorder %s667_s14, 1 }
   0x9   : > { %p908_p4 = por %p61_p1, %p60_p0  ;;  %p668_p5 = scmp.ge.s32.totalorder %s860_s12, 1 }
   0xa   : > { %p913_p6 = por %p90_p3, %p60_p0  ;;  %p97_p7 = scmp.lt.s32.totalorder %s860_s12, 3 }
   0xb   : > { %s109_s19 = sshll.u32 %s1417_s0, 4  ;;  %s929_s21 = sadd.s32 1, %s860_s12   ;;  %s110_s19 = int_to_ptr.hbm [resolvable:$true] %s109_s19 }
   0xc   : > { %p921_p8 = pnand %p668_p5, %p97_p7  ;;  %s44_s22 = ssub.s32 %s860_s12, %s929_s21 }
   0xd   : > { %p45_p12 = scmp.eq.s32.totalorder %s44_s22, 0  ;;  %s47_s23 = sadd.s32 1, %s856_s11 }
   0xe   : > { %p696_p10 = pneg %p921_p8  ;;  %p54_p13 = scmp.ne.s32.totalorder %s856_s11, %s852_s10 }
   0xf   : > { %s862_s24 = smov [#allocation2]   ;;  %p55_p0 = scmp.eq.s32.totalorder %s860_s12, 0 }
  0x10   : > { %p697_p11 = pnand %p696_p10, %p61_p1  ;;  %p944_p3 = por %p84_p2, %p54_p13 }
  0x11   : > { %s939_s25 = scalar_select %p45_p12, %s856_s11, %s47_s23  }
  0x12   : > { %699 = dma.hbm_to_smem (!%p697_p11), %s110_s19, 16, %s862_s24, [#allocation5]  }
  0x13   : > { %s120_s27 = sand.u32 1, %s856_s11   ;;  %p56_p5 = por %p55_p0, %p54_p13 }
  0x14   : > { %p709_p7 = scmp.lt.s32.totalorder %s860_s12, 2  ;;  %s671_s28 = sshll.u32 %s120_s27, 9 }
  0x15   : > { %s686_s29 = sshll.u32 %s860_s12, 9  ;;  %s124_s6 = scalar_lea.vmem [#allocation6], %s671_s28 }
  0x16   : > { %s129_s4 = scalar_lea.hbm %s1418_s1, %s686_s29  ;;  %s133_s7 = sshll.u32 %s124_s6, 4  ;;  %s134_s7 = int_to_ptr.vmem [resolvable:$true] %s133_s7 }
  0x17   : > { %s131_s5 = sshll.u32 %s129_s4, 4  ;;  %p954_p10 = pnand %p709_p7, %p56_p5  ;;  %s132_s5 = int_to_ptr.hbm [resolvable:$true] %s131_s5 }
  0x18   : > { %s121_s14 = scalar_lea.sflag [#allocation3], %s120_s27  ;;  %s760_s17 = sshra.s32 %s132_s5, 4  ;;  %s761_s17 = int_to_ptr.hbm [resolvable:$true] %s760_s17 }
  0x19   : > { %s762_s18 = scalar_lea.hbm %s761_s17, 512  ;;  %p764_p11 = pneg %p954_p10 }
  0x1a   : > { %p763_p2 = scmp.ne.s32.totalorder %s761_s17, %s762_s18  ;;  %s767_s23 = scalar_lea.hbm %s1418_s1, 1024 }
  0x1b   : > { %p768_p0 = scmp.lt.s32.totalorder %s761_s17, %s1418_s1  ;;  %p769_p5 = scmp.lt.s32.totalorder %s767_s23, %s762_s18 }
  0x1c   : > { %p765_p12 = pnand %p764_p11, %p763_p2 }
  0x1d   : > { %p770_p7 = por %p769_p5, %p768_p0 }
  0x1e   : > { %p766_p13 = pneg %p765_p12 }
  0x20   : > { %p771_p9 = pnand %p770_p7, %p766_p13 }
  0x22   : > { %774 = shalt.err (!%p771_p9)
}
  0x23   : > { %703 = dma.hbm_to_vmem [thread:$0]  (!%p954_p10), %s132_s5, 8192, %s134_s7, %s121_s14  }
  0x24   : > { %142 = sbr.rel (%p921_p8) target bundleno = 129 (0x81), region = 28 }
  0x29   : > { %835 = dma.done.wait (%p61_p1), [#allocation5], 16  }
  0x2a   : > { %837 = vsyncadd (%p61_p1), [#allocation5], 4294967280  ;;  %s975_s27 = sand.u32 1, %s852_s10  }
  0x2b   : > { %s676_s29 = sshll.u32 %s975_s27, 9  ;;  %s150_s30 = scalar_lea.sflag [#allocation3], %s975_s27 }
  0x2c   : > { %s981_s3 = scalar_lea.vmem [#allocation6], %s676_s29 }
  0x2d   : > { %839 = dma.done.wait (%p908_p4), %s150_s30, 8192  }
  0x2e   : > { %841 = vsyncadd (%p908_p4), %s150_s30, 4294959104 }
  0x2f   : > { %159 = sfence }
  0x30   : > { %s176_s20 = sld [smem:[#allocation2]]  ;;  %v180_v0 = vld [vmem:[%s981_s3] sm:$0xff]  ;;  %v181_v1 = vld [vmem:[%s981_s3 + $0x8] sm:$0xff]  ;;  %v182_v2 = vld [vmem:[%s981_s3 + $0x10] sm:$0xff]  ;;  %s1040_s15 = scalar_lea.vmem [#allocation7], %s676_s29 }
  0x31   : > { %s678_s4 = sld [smem:[#allocation2 + $0x1]]  ;;  %v183_v3 = vld [vmem:[%s981_s3 + $0x18] sm:$0xff]  ;;  %v184_v4 = vld [vmem:[%s981_s3 + $0x20] sm:$0xff]  ;;  %v185_v5 = vld [vmem:[%s981_s3 + $0x28] sm:$0xff]  ;;  %s687_s7 = sshll.u32 %s899_s13, 9 }
  0x32   : > { %s679_s5 = sld [smem:[#allocation2 + $0x2]]  ;;  %v186_v11 = vld [vmem:[%s981_s3 + $0x30] sm:$0xff]  ;;  %v187_v16 = vld [vmem:[%s981_s3 + $0x38] sm:$0xff]  ;;  %v188_v33 = vld [vmem:[%s981_s3 + $0x40] sm:$0xff]  ;;  %s580_s14 = scalar_lea.hbm %s1419_s2, %s687_s7 }
  0x33   : > { %s680_s6 = sld [smem:[#allocation2 + $0x3]]  ;;  %v189_v34 = vld [vmem:[%s981_s3 + $0x48] sm:$0xff]  ;;  %v190_v35 = vld [vmem:[%s981_s3 + $0x50] sm:$0xff]  ;;  %v191_v40 = vld [vmem:[%s981_s3 + $0x58] sm:$0xff]  ;;  %s582_s17 = sshll.u32 %s1040_s15, 4  ;;  %s583_s17 = int_to_ptr.vmem [resolvable:$true] %s582_s17 }
  0x34   : > { %v192_v41 = vld [vmem:[%s981_s3 + $0x60] sm:$0xff]  ;;  %v193_v42 = vld [vmem:[%s981_s3 + $0x68] sm:$0xff]  ;;  %v194_v51 = vld [vmem:[%s981_s3 + $0x70] sm:$0xff]  ;;  %s584_s18 = sshll.u32 %s580_s14, 4  ;;  %s569_s19 = scalar_lea.sflag [#allocation4], %s975_s27  ;;  %s585_s18 = int_to_ptr.hbm [resolvable:$true] %s584_s18 }
  0x35   : > { %v195_v56 = vld [vmem:[%s981_s3 + $0x78] sm:$0xff]  ;;  %s804_s22 = sshra.s32 %s585_s18, 4  ;;  %s810_s29 = scalar_lea.hbm %s1419_s2, 1024  ;;  %s805_s22 = int_to_ptr.hbm [resolvable:$true] %s804_s22 }
  0x36   : > { %v993_v6 = vstv %s176_s20  ;;  %s806_s23 = scalar_lea.hbm %s805_s22, 512  ;;  %p811_p9 = scmp.lt.s32.totalorder %s805_s22, %s1419_s2 }
  0x37   : > { %v245_v7 = vmul.f32 %v993_v6, %v180_v0  ;;  %v996_v8 = vstv %s678_s4  ;;  %v246_v9 = vmul.f32 %v993_v6, %v181_v1  ;;  %v247_v10 = vmul.f32 %v993_v6, %v182_v2  ;;  %p807_p1 = scmp.ne.s32.totalorder %s805_s22, %s806_s23  ;;  %p812_p10 = scmp.lt.s32.totalorder %s810_s29, %s806_s23 }
  0x38   : > { %v1001_v12 = vstv %s679_s5  ;;  %v248_v13 = vmul.f32 %v993_v6, %v183_v3  ;;  %v249_v14 = vmul.f32 %v993_v6, %v184_v4  ;;  %v250_v15 = vmul.f32 %v993_v6, %v185_v5 }
  0x39   : > { %v310_v17 = vadd.f32 %v996_v8, %v245_v7  ;;  %v1008_v18 = vstv %s680_s6  ;;  %v311_v19 = vadd.f32 %v996_v8, %v246_v9  ;;  %v312_v20 = vadd.f32 %v996_v8, %v247_v10  ;;  %p808_p4 = pnand %p807_p1, %p944_p3  ;;  %p813_p2 = por %p812_p10, %p811_p9 }
  0x3a   : > { %v313_v21 = vadd.f32 %v996_v8, %v248_v13  ;;  %v314_v22 = vadd.f32 %v996_v8, %v249_v14  ;;  %v315_v23 = vadd.f32 %v996_v8, %v250_v15  ;;  %v251_v24 = vmul.f32 %v993_v6, %v186_v11  ;;  %v196_v11 = vld [vmem:[%s981_s3 + $0x80] sm:$0xff]  ;;  %v197_v13 = vld [vmem:[%s981_s3 + $0x88] sm:$0xff]  ;;  %v198_v14 = vld [vmem:[%s981_s3 + $0x90] sm:$0xff] }
  0x3b   : > { %v375_v25 = vmax.f32 %v310_v17, %v1001_v12  ;;  %v376_v26 = vmax.f32 %v311_v19, %v1001_v12  ;;  %v377_v27 = vmax.f32 %v312_v20, %v1001_v12  ;;  %v252_v28 = vmul.f32 %v993_v6, %v187_v16  ;;  %v199_v20 = vld [vmem:[%s981_s3 + $0x98] sm:$0xff]  ;;  %p809_p8 = pneg %p808_p4 }
  0x3c   : > { %v378_v29 = vmax.f32 %v313_v21, %v1001_v12  ;;  %v379_v30 = vmax.f32 %v314_v22, %v1001_v12  ;;  %v380_v31 = vmax.f32 %v315_v23, %v1001_v12  ;;  %v316_v32 = vadd.f32 %v996_v8, %v251_v24  ;;  %v200_v21 = vld [vmem:[%s981_s3 + $0xa0] sm:$0xff]  ;;  %v201_v22 = vld [vmem:[%s981_s3 + $0xa8] sm:$0xff] }
  0x3d   : > { %v440_v36 = vmin.f32 %v375_v25, %v1008_v18  ;;  %v441_v37 = vmin.f32 %v376_v26, %v1008_v18  ;;  %v442_v38 = vmin.f32 %v377_v27, %v1008_v18  ;;  %v317_v39 = vadd.f32 %v996_v8, %v252_v28  ;;  %p814_p11 = pnand %p813_p2, %p809_p8 }
  0x3e   : > { %v443_v43 = vmin.f32 %v378_v29, %v1008_v18  ;;  %v444_v44 = vmin.f32 %v379_v30, %v1008_v18  ;;  %v445_v45 = vmin.f32 %v380_v31, %v1008_v18  ;;  %v381_v46 = vmax.f32 %v316_v32, %v1001_v12  ;;  %v202_v31 = vld [vmem:[%s981_s3 + $0xb0] sm:$0xff] }
  0x3f   : > { %504 = vst [vmem:[%s1040_s15] sm:$0xff] %v440_v36  ;;  %v382_v47 = vmax.f32 %v317_v39, %v1001_v12  ;;  %v253_v48 = vmul.f32 %v993_v6, %v188_v33  ;;  %v254_v49 = vmul.f32 %v993_v6, %v189_v34  ;;  %v255_v50 = vmul.f32 %v993_v6, %v190_v35  ;;  %v203_v36 = vld [vmem:[%s981_s3 + $0xb8] sm:$0xff] }
  0x40   : > { %505 = vst [vmem:[%s1040_s15 + $0x8] sm:$0xff] %v441_v37  ;;  %v446_v52 = vmin.f32 %v381_v46, %v1008_v18  ;;  %v256_v53 = vmul.f32 %v993_v6, %v191_v40  ;;  %v257_v54 = vmul.f32 %v993_v6, %v192_v41  ;;  %v258_v55 = vmul.f32 %v993_v6, %v193_v42 }
  0x41   : > { %506 = vst [vmem:[%s1040_s15 + $0x10] sm:$0xff] %v442_v38  ;;  %v447_v57 = vmin.f32 %v382_v47, %v1008_v18  ;;  %v318_v58 = vadd.f32 %v996_v8, %v253_v48  ;;  %v319_v59 = vadd.f32 %v996_v8, %v254_v49  ;;  %v320_v60 = vadd.f32 %v996_v8, %v255_v50 }
  0x42   : > { %507 = vst [vmem:[%s1040_s15 + $0x18] sm:$0xff] %v443_v43  ;;  %v321_v61 = vadd.f32 %v996_v8, %v256_v53  ;;  %v322_v62 = vadd.f32 %v996_v8, %v257_v54  ;;  %v323_v63 = vadd.f32 %v996_v8, %v258_v55  ;;  %v259_v0 = vmul.f32 %v993_v6, %v194_v51  ;;  %v204_v53 = vld [vmem:[%s981_s3 + $0xc0] sm:$0xff]  ;;  %v205_v54 = vld [vmem:[%s981_s3 + $0xc8] sm:$0xff]  ;;  %v206_v55 = vld [vmem:[%s981_s3 + $0xd0] sm:$0xff] }
  0x43   : > { %508 = vst [vmem:[%s1040_s15 + $0x20] sm:$0xff] %v444_v44  ;;  %v383_v1 = vmax.f32 %v318_v58, %v1001_v12  ;;  %v384_v2 = vmax.f32 %v319_v59, %v1001_v12  ;;  %v385_v3 = vmax.f32 %v320_v60, %v1001_v12  ;;  %v260_v4 = vmul.f32 %v993_v6, %v195_v56  ;;  %v207_v60 = vld [vmem:[%s981_s3 + $0xd8] sm:$0xff] }
  0x44   : > { %509 = vst [vmem:[%s1040_s15 + $0x28] sm:$0xff] %v445_v45  ;;  %v386_v5 = vmax.f32 %v321_v61, %v1001_v12  ;;  %v387_v7 = vmax.f32 %v322_v62, %v1001_v12  ;;  %v388_v9 = vmax.f32 %v323_v63, %v1001_v12  ;;  %v324_v10 = vadd.f32 %v996_v8, %v259_v0  ;;  %v208_v61 = vld [vmem:[%s981_s3 + $0xe0] sm:$0xff]  ;;  %v209_v62 = vld [vmem:[%s981_s3 + $0xe8] sm:$0xff] }
  0x45   : > { %510 = vst [vmem:[%s1040_s15 + $0x30] sm:$0xff] %v446_v52  ;;  %v448_v15 = vmin.f32 %v383_v1, %v1008_v18  ;;  %v449_v16 = vmin.f32 %v384_v2, %v1008_v18  ;;  %v450_v17 = vmin.f32 %v385_v3, %v1008_v18  ;;  %v325_v19 = vadd.f32 %v996_v8, %v260_v4 }
  0x46   : > { %511 = vst [vmem:[%s1040_s15 + $0x38] sm:$0xff] %v447_v57  ;;  %v451_v23 = vmin.f32 %v386_v5, %v1008_v18  ;;  %v452_v24 = vmin.f32 %v387_v7, %v1008_v18  ;;  %v453_v25 = vmin.f32 %v388_v9, %v1008_v18  ;;  %v389_v26 = vmax.f32 %v324_v10, %v1001_v12  ;;  %v210_v9 = vld [vmem:[%s981_s3 + $0xf0] sm:$0xff] }
  0x47   : > { %512 = vst [vmem:[%s1040_s15 + $0x40] sm:$0xff] %v448_v15  ;;  %v390_v27 = vmax.f32 %v325_v19, %v1001_v12  ;;  %v261_v28 = vmul.f32 %v993_v6, %v196_v11  ;;  %v262_v29 = vmul.f32 %v993_v6, %v197_v13  ;;  %v263_v30 = vmul.f32 %v993_v6, %v198_v14  ;;  %v211_v15 = vld [vmem:[%s981_s3 + $0xf8] sm:$0xff] }
  0x48   : > { %513 = vst [vmem:[%s1040_s15 + $0x48] sm:$0xff] %v449_v16  ;;  %v454_v32 = vmin.f32 %v389_v26, %v1008_v18  ;;  %v264_v33 = vmul.f32 %v993_v6, %v199_v20  ;;  %v265_v34 = vmul.f32 %v993_v6, %v200_v21  ;;  %v266_v35 = vmul.f32 %v993_v6, %v201_v22 }
  0x49   : > { %514 = vst [vmem:[%s1040_s15 + $0x50] sm:$0xff] %v450_v17  ;;  %v455_v37 = vmin.f32 %v390_v27, %v1008_v18  ;;  %v326_v38 = vadd.f32 %v996_v8, %v261_v28  ;;  %v327_v39 = vadd.f32 %v996_v8, %v262_v29  ;;  %v328_v40 = vadd.f32 %v996_v8, %v263_v30 }
  0x4a   : > { %515 = vst [vmem:[%s1040_s15 + $0x58] sm:$0xff] %v451_v23  ;;  %v329_v41 = vadd.f32 %v996_v8, %v264_v33  ;;  %v330_v42 = vadd.f32 %v996_v8, %v265_v34  ;;  %v331_v43 = vadd.f32 %v996_v8, %v266_v35  ;;  %v267_v44 = vmul.f32 %v993_v6, %v202_v31  ;;  %v212_v33 = vld [vmem:[%s981_s3 + $0x100] sm:$0xff]  ;;  %v213_v34 = vld [vmem:[%s981_s3 + $0x108] sm:$0xff]  ;;  %v214_v35 = vld [vmem:[%s981_s3 + $0x110] sm:$0xff] }
  0x4b   : > { %516 = vst [vmem:[%s1040_s15 + $0x60] sm:$0xff] %v452_v24  ;;  %v391_v45 = vmax.f32 %v326_v38, %v1001_v12  ;;  %v392_v46 = vmax.f32 %v327_v39, %v1001_v12  ;;  %v393_v47 = vmax.f32 %v328_v40, %v1001_v12  ;;  %v268_v48 = vmul.f32 %v993_v6, %v203_v36  ;;  %v215_v40 = vld [vmem:[%s981_s3 + $0x118] sm:$0xff] }
  0x4c   : > { %517 = vst [vmem:[%s1040_s15 + $0x68] sm:$0xff] %v453_v25  ;;  %v394_v49 = vmax.f32 %v329_v41, %v1001_v12  ;;  %v395_v50 = vmax.f32 %v330_v42, %v1001_v12  ;;  %v396_v51 = vmax.f32 %v331_v43, %v1001_v12  ;;  %v332_v52 = vadd.f32 %v996_v8, %v267_v44  ;;  %v216_v41 = vld [vmem:[%s981_s3 + $0x120] sm:$0xff]  ;;  %v217_v42 = vld [vmem:[%s981_s3 + $0x128] sm:$0xff] }
  0x4d   : > { %518 = vst [vmem:[%s1040_s15 + $0x70] sm:$0xff] %v454_v32  ;;  %v456_v56 = vmin.f32 %v391_v45, %v1008_v18  ;;  %v457_v57 = vmin.f32 %v392_v46, %v1008_v18  ;;  %v458_v58 = vmin.f32 %v393_v47, %v1008_v18  ;;  %v333_v59 = vadd.f32 %v996_v8, %v268_v48 }
  0x4e   : > { %519 = vst [vmem:[%s1040_s15 + $0x78] sm:$0xff] %v455_v37  ;;  %v459_v63 = vmin.f32 %v394_v49, %v1008_v18  ;;  %v460_v0 = vmin.f32 %v395_v50, %v1008_v18  ;;  %v461_v1 = vmin.f32 %v396_v51, %v1008_v18  ;;  %v397_v2 = vmax.f32 %v332_v52, %v1001_v12  ;;  %v218_v51 = vld [vmem:[%s981_s3 + $0x130] sm:$0xff] }
  0x4f   : > { %520 = vst [vmem:[%s1040_s15 + $0x80] sm:$0xff] %v456_v56  ;;  %v398_v3 = vmax.f32 %v333_v59, %v1001_v12  ;;  %v269_v4 = vmul.f32 %v993_v6, %v204_v53  ;;  %v270_v5 = vmul.f32 %v993_v6, %v205_v54  ;;  %v271_v7 = vmul.f32 %v993_v6, %v206_v55  ;;  %v219_v56 = vld [vmem:[%s981_s3 + $0x138] sm:$0xff] }
  0x50   : > { %521 = vst [vmem:[%s1040_s15 + $0x88] sm:$0xff] %v457_v57  ;;  %v462_v10 = vmin.f32 %v397_v2, %v1008_v18  ;;  %v272_v11 = vmul.f32 %v993_v6, %v207_v60  ;;  %v273_v13 = vmul.f32 %v993_v6, %v208_v61  ;;  %v274_v14 = vmul.f32 %v993_v6, %v209_v62 }
  0x51   : > { %522 = vst [vmem:[%s1040_s15 + $0x90] sm:$0xff] %v458_v58  ;;  %v463_v16 = vmin.f32 %v398_v3, %v1008_v18  ;;  %v334_v17 = vadd.f32 %v996_v8, %v269_v4  ;;  %v335_v19 = vadd.f32 %v996_v8, %v270_v5  ;;  %v336_v20 = vadd.f32 %v996_v8, %v271_v7 }
  0x52   : > { %523 = vst [vmem:[%s1040_s15 + $0x98] sm:$0xff] %v459_v63  ;;  %v337_v21 = vadd.f32 %v996_v8, %v272_v11  ;;  %v338_v22 = vadd.f32 %v996_v8, %v273_v13  ;;  %v339_v23 = vadd.f32 %v996_v8, %v274_v14  ;;  %v275_v24 = vmul.f32 %v993_v6, %v210_v9  ;;  %v220_v11 = vld [vmem:[%s981_s3 + $0x140] sm:$0xff]  ;;  %v221_v13 = vld [vmem:[%s981_s3 + $0x148] sm:$0xff]  ;;  %v222_v14 = vld [vmem:[%s981_s3 + $0x150] sm:$0xff] }
  0x53   : > { %524 = vst [vmem:[%s1040_s15 + $0xa0] sm:$0xff] %v460_v0  ;;  %v399_v25 = vmax.f32 %v334_v17, %v1001_v12  ;;  %v400_v26 = vmax.f32 %v335_v19, %v1001_v12  ;;  %v401_v27 = vmax.f32 %v336_v20, %v1001_v12  ;;  %v276_v28 = vmul.f32 %v993_v6, %v211_v15  ;;  %v223_v20 = vld [vmem:[%s981_s3 + $0x158] sm:$0xff] }
  0x54   : > { %525 = vst [vmem:[%s1040_s15 + $0xa8] sm:$0xff] %v461_v1  ;;  %v402_v29 = vmax.f32 %v337_v21, %v1001_v12  ;;  %v403_v30 = vmax.f32 %v338_v22, %v1001_v12  ;;  %v404_v31 = vmax.f32 %v339_v23, %v1001_v12  ;;  %v340_v32 = vadd.f32 %v996_v8, %v275_v24  ;;  %v224_v21 = vld [vmem:[%s981_s3 + $0x160] sm:$0xff]  ;;  %v225_v22 = vld [vmem:[%s981_s3 + $0x168] sm:$0xff] }
  0x55   : > { %526 = vst [vmem:[%s1040_s15 + $0xb0] sm:$0xff] %v462_v10  ;;  %v464_v36 = vmin.f32 %v399_v25, %v1008_v18  ;;  %v465_v37 = vmin.f32 %v400_v26, %v1008_v18  ;;  %v466_v38 = vmin.f32 %v401_v27, %v1008_v18  ;;  %v341_v39 = vadd.f32 %v996_v8, %v276_v28 }
  0x56   : > { %527 = vst [vmem:[%s1040_s15 + $0xb8] sm:$0xff] %v463_v16  ;;  %v467_v43 = vmin.f32 %v402_v29, %v1008_v18  ;;  %v468_v44 = vmin.f32 %v403_v30, %v1008_v18  ;;  %v469_v45 = vmin.f32 %v404_v31, %v1008_v18  ;;  %v405_v46 = vmax.f32 %v340_v32, %v1001_v12  ;;  %v226_v31 = vld [vmem:[%s981_s3 + $0x170] sm:$0xff] }
  0x57   : > { %528 = vst [vmem:[%s1040_s15 + $0xc0] sm:$0xff] %v464_v36  ;;  %v406_v47 = vmax.f32 %v341_v39, %v1001_v12  ;;  %v277_v48 = vmul.f32 %v993_v6, %v212_v33  ;;  %v278_v49 = vmul.f32 %v993_v6, %v213_v34  ;;  %v279_v50 = vmul.f32 %v993_v6, %v214_v35  ;;  %v227_v36 = vld [vmem:[%s981_s3 + $0x178] sm:$0xff] }
  0x58   : > { %529 = vst [vmem:[%s1040_s15 + $0xc8] sm:$0xff] %v465_v37  ;;  %v470_v52 = vmin.f32 %v405_v46, %v1008_v18  ;;  %v280_v53 = vmul.f32 %v993_v6, %v215_v40  ;;  %v281_v54 = vmul.f32 %v993_v6, %v216_v41  ;;  %v282_v55 = vmul.f32 %v993_v6, %v217_v42 }
  0x59   : > { %530 = vst [vmem:[%s1040_s15 + $0xd0] sm:$0xff] %v466_v38  ;;  %v471_v57 = vmin.f32 %v406_v47, %v1008_v18  ;;  %v342_v58 = vadd.f32 %v996_v8, %v277_v48  ;;  %v343_v59 = vadd.f32 %v996_v8, %v278_v49  ;;  %v344_v60 = vadd.f32 %v996_v8, %v279_v50 }
  0x5a   : > { %531 = vst [vmem:[%s1040_s15 + $0xd8] sm:$0xff] %v467_v43  ;;  %v345_v61 = vadd.f32 %v996_v8, %v280_v53  ;;  %v346_v62 = vadd.f32 %v996_v8, %v281_v54  ;;  %v347_v63 = vadd.f32 %v996_v8, %v282_v55  ;;  %v283_v0 = vmul.f32 %v993_v6, %v218_v51  ;;  %v228_v53 = vld [vmem:[%s981_s3 + $0x180] sm:$0xff]  ;;  %v229_v54 = vld [vmem:[%s981_s3 + $0x188] sm:$0xff]  ;;  %v230_v55 = vld [vmem:[%s981_s3 + $0x190] sm:$0xff] }
  0x5b   : > { %532 = vst [vmem:[%s1040_s15 + $0xe0] sm:$0xff] %v468_v44  ;;  %v407_v1 = vmax.f32 %v342_v58, %v1001_v12  ;;  %v408_v2 = vmax.f32 %v343_v59, %v1001_v12  ;;  %v409_v3 = vmax.f32 %v344_v60, %v1001_v12  ;;  %v284_v4 = vmul.f32 %v993_v6, %v219_v56  ;;  %v231_v60 = vld [vmem:[%s981_s3 + $0x198] sm:$0xff] }
  0x5c   : > { %533 = vst [vmem:[%s1040_s15 + $0xe8] sm:$0xff] %v469_v45  ;;  %v410_v5 = vmax.f32 %v345_v61, %v1001_v12  ;;  %v411_v7 = vmax.f32 %v346_v62, %v1001_v12  ;;  %v412_v9 = vmax.f32 %v347_v63, %v1001_v12  ;;  %v348_v10 = vadd.f32 %v996_v8, %v283_v0  ;;  %v232_v61 = vld [vmem:[%s981_s3 + $0x1a0] sm:$0xff]  ;;  %v233_v62 = vld [vmem:[%s981_s3 + $0x1a8] sm:$0xff] }
  0x5d   : > { %534 = vst [vmem:[%s1040_s15 + $0xf0] sm:$0xff] %v470_v52  ;;  %v472_v15 = vmin.f32 %v407_v1, %v1008_v18  ;;  %v473_v16 = vmin.f32 %v408_v2, %v1008_v18  ;;  %v474_v17 = vmin.f32 %v409_v3, %v1008_v18  ;;  %v349_v19 = vadd.f32 %v996_v8, %v284_v4 }
  0x5e   : > { %535 = vst [vmem:[%s1040_s15 + $0xf8] sm:$0xff] %v471_v57  ;;  %v475_v23 = vmin.f32 %v410_v5, %v1008_v18  ;;  %v476_v24 = vmin.f32 %v411_v7, %v1008_v18  ;;  %v477_v25 = vmin.f32 %v412_v9, %v1008_v18  ;;  %v413_v26 = vmax.f32 %v348_v10, %v1001_v12  ;;  %v234_v9 = vld [vmem:[%s981_s3 + $0x1b0] sm:$0xff] }
  0x5f   : > { %536 = vst [vmem:[%s1040_s15 + $0x100] sm:$0xff] %v472_v15  ;;  %v414_v27 = vmax.f32 %v349_v19, %v1001_v12  ;;  %v285_v28 = vmul.f32 %v993_v6, %v220_v11  ;;  %v286_v29 = vmul.f32 %v993_v6, %v221_v13  ;;  %v287_v30 = vmul.f32 %v993_v6, %v222_v14  ;;  %v235_v15 = vld [vmem:[%s981_s3 + $0x1b8] sm:$0xff] }
  0x60   : > { %537 = vst [vmem:[%s1040_s15 + $0x108] sm:$0xff] %v473_v16  ;;  %v478_v32 = vmin.f32 %v413_v26, %v1008_v18  ;;  %v288_v33 = vmul.f32 %v993_v6, %v223_v20  ;;  %v289_v34 = vmul.f32 %v993_v6, %v224_v21  ;;  %v290_v35 = vmul.f32 %v993_v6, %v225_v22 }
  0x61   : > { %538 = vst [vmem:[%s1040_s15 + $0x110] sm:$0xff] %v474_v17  ;;  %v479_v37 = vmin.f32 %v414_v27, %v1008_v18  ;;  %v350_v38 = vadd.f32 %v996_v8, %v285_v28  ;;  %v351_v39 = vadd.f32 %v996_v8, %v286_v29  ;;  %v352_v40 = vadd.f32 %v996_v8, %v287_v30 }
  0x62   : > { %539 = vst [vmem:[%s1040_s15 + $0x118] sm:$0xff] %v475_v23  ;;  %v353_v41 = vadd.f32 %v996_v8, %v288_v33  ;;  %v354_v42 = vadd.f32 %v996_v8, %v289_v34  ;;  %v355_v43 = vadd.f32 %v996_v8, %v290_v35  ;;  %v291_v44 = vmul.f32 %v993_v6, %v226_v31  ;;  %v236_v33 = vld [vmem:[%s981_s3 + $0x1c0] sm:$0xff]  ;;  %v237_v34 = vld [vmem:[%s981_s3 + $0x1c8] sm:$0xff]  ;;  %v238_v35 = vld [vmem:[%s981_s3 + $0x1d0] sm:$0xff] }
  0x63   : > { %540 = vst [vmem:[%s1040_s15 + $0x120] sm:$0xff] %v476_v24  ;;  %v415_v45 = vmax.f32 %v350_v38, %v1001_v12  ;;  %v416_v46 = vmax.f32 %v351_v39, %v1001_v12  ;;  %v417_v47 = vmax.f32 %v352_v40, %v1001_v12  ;;  %v292_v48 = vmul.f32 %v993_v6, %v227_v36  ;;  %v239_v40 = vld [vmem:[%s981_s3 + $0x1d8] sm:$0xff] }
  0x64   : > { %541 = vst [vmem:[%s1040_s15 + $0x128] sm:$0xff] %v477_v25  ;;  %v418_v49 = vmax.f32 %v353_v41, %v1001_v12  ;;  %v419_v50 = vmax.f32 %v354_v42, %v1001_v12  ;;  %v420_v51 = vmax.f32 %v355_v43, %v1001_v12  ;;  %v356_v52 = vadd.f32 %v996_v8, %v291_v44  ;;  %v240_v41 = vld [vmem:[%s981_s3 + $0x1e0] sm:$0xff]  ;;  %v241_v42 = vld [vmem:[%s981_s3 + $0x1e8] sm:$0xff] }
  0x65   : > { %542 = vst [vmem:[%s1040_s15 + $0x130] sm:$0xff] %v478_v32  ;;  %v480_v56 = vmin.f32 %v415_v45, %v1008_v18  ;;  %v481_v57 = vmin.f32 %v416_v46, %v1008_v18  ;;  %v482_v58 = vmin.f32 %v417_v47, %v1008_v18  ;;  %v357_v59 = vadd.f32 %v996_v8, %v292_v48 }
  0x66   : > { %543 = vst [vmem:[%s1040_s15 + $0x138] sm:$0xff] %v479_v37  ;;  %v483_v63 = vmin.f32 %v418_v49, %v1008_v18  ;;  %v484_v0 = vmin.f32 %v419_v50, %v1008_v18  ;;  %v485_v1 = vmin.f32 %v420_v51, %v1008_v18  ;;  %v421_v2 = vmax.f32 %v356_v52, %v1001_v12  ;;  %v242_v51 = vld [vmem:[%s981_s3 + $0x1f0] sm:$0xff] }
  0x67   : > { %544 = vst [vmem:[%s1040_s15 + $0x140] sm:$0xff] %v480_v56  ;;  %v422_v3 = vmax.f32 %v357_v59, %v1001_v12  ;;  %v293_v4 = vmul.f32 %v993_v6, %v228_v53  ;;  %v294_v5 = vmul.f32 %v993_v6, %v229_v54  ;;  %v295_v7 = vmul.f32 %v993_v6, %v230_v55  ;;  %v243_v56 = vld [vmem:[%s981_s3 + $0x1f8] sm:$0xff] }
  0x68   : > { %545 = vst [vmem:[%s1040_s15 + $0x148] sm:$0xff] %v481_v57  ;;  %v486_v10 = vmin.f32 %v421_v2, %v1008_v18  ;;  %v296_v11 = vmul.f32 %v993_v6, %v231_v60  ;;  %v297_v13 = vmul.f32 %v993_v6, %v232_v61  ;;  %v298_v14 = vmul.f32 %v993_v6, %v233_v62 }
  0x69   : > { %546 = vst [vmem:[%s1040_s15 + $0x150] sm:$0xff] %v482_v58  ;;  %v487_v16 = vmin.f32 %v422_v3, %v1008_v18  ;;  %v358_v17 = vadd.f32 %v996_v8, %v293_v4  ;;  %v359_v19 = vadd.f32 %v996_v8, %v294_v5  ;;  %v360_v20 = vadd.f32 %v996_v8, %v295_v7 }
  0x6a   : > { %547 = vst [vmem:[%s1040_s15 + $0x158] sm:$0xff] %v483_v63  ;;  %v361_v21 = vadd.f32 %v996_v8, %v296_v11  ;;  %v362_v22 = vadd.f32 %v996_v8, %v297_v13  ;;  %v363_v23 = vadd.f32 %v996_v8, %v298_v14  ;;  %v299_v24 = vmul.f32 %v993_v6, %v234_v9 }
  0x6b   : > { %548 = vst [vmem:[%s1040_s15 + $0x160] sm:$0xff] %v484_v0  ;;  %v423_v25 = vmax.f32 %v358_v17, %v1001_v12  ;;  %v424_v26 = vmax.f32 %v359_v19, %v1001_v12  ;;  %v425_v27 = vmax.f32 %v360_v20, %v1001_v12  ;;  %v300_v28 = vmul.f32 %v993_v6, %v235_v15 }
  0x6c   : > { %549 = vst [vmem:[%s1040_s15 + $0x168] sm:$0xff] %v485_v1  ;;  %v426_v29 = vmax.f32 %v361_v21, %v1001_v12  ;;  %v427_v30 = vmax.f32 %v362_v22, %v1001_v12  ;;  %v428_v31 = vmax.f32 %v363_v23, %v1001_v12  ;;  %v364_v32 = vadd.f32 %v996_v8, %v299_v24 }
  0x6d   : > { %550 = vst [vmem:[%s1040_s15 + $0x170] sm:$0xff] %v486_v10  ;;  %v488_v36 = vmin.f32 %v423_v25, %v1008_v18  ;;  %v489_v37 = vmin.f32 %v424_v26, %v1008_v18  ;;  %v490_v38 = vmin.f32 %v425_v27, %v1008_v18  ;;  %v365_v39 = vadd.f32 %v996_v8, %v300_v28 }
  0x6e   : > { %551 = vst [vmem:[%s1040_s15 + $0x178] sm:$0xff] %v487_v16  ;;  %v491_v43 = vmin.f32 %v426_v29, %v1008_v18  ;;  %v492_v44 = vmin.f32 %v427_v30, %v1008_v18  ;;  %v493_v45 = vmin.f32 %v428_v31, %v1008_v18  ;;  %v429_v46 = vmax.f32 %v364_v32, %v1001_v12 }
  0x6f   : > { %552 = vst [vmem:[%s1040_s15 + $0x180] sm:$0xff] %v488_v36  ;;  %v430_v47 = vmax.f32 %v365_v39, %v1001_v12  ;;  %v301_v48 = vmul.f32 %v993_v6, %v236_v33  ;;  %v302_v49 = vmul.f32 %v993_v6, %v237_v34  ;;  %v303_v50 = vmul.f32 %v993_v6, %v238_v35 }
  0x70   : > { %553 = vst [vmem:[%s1040_s15 + $0x188] sm:$0xff] %v489_v37  ;;  %v494_v52 = vmin.f32 %v429_v46, %v1008_v18  ;;  %v304_v53 = vmul.f32 %v993_v6, %v239_v40  ;;  %v305_v54 = vmul.f32 %v993_v6, %v240_v41  ;;  %v306_v55 = vmul.f32 %v993_v6, %v241_v42 }
  0x71   : > { %554 = vst [vmem:[%s1040_s15 + $0x190] sm:$0xff] %v490_v38  ;;  %v495_v57 = vmin.f32 %v430_v47, %v1008_v18  ;;  %v366_v58 = vadd.f32 %v996_v8, %v301_v48  ;;  %v367_v59 = vadd.f32 %v996_v8, %v302_v49  ;;  %v368_v60 = vadd.f32 %v996_v8, %v303_v50 }
  0x72   : > { %555 = vst [vmem:[%s1040_s15 + $0x198] sm:$0xff] %v491_v43  ;;  %v369_v61 = vadd.f32 %v996_v8, %v304_v53  ;;  %v370_v62 = vadd.f32 %v996_v8, %v305_v54  ;;  %v371_v63 = vadd.f32 %v996_v8, %v306_v55  ;;  %v307_v0 = vmul.f32 %v993_v6, %v242_v51 }
  0x73   : > { %556 = vst [vmem:[%s1040_s15 + $0x1a0] sm:$0xff] %v492_v44  ;;  %v431_v1 = vmax.f32 %v366_v58, %v1001_v12  ;;  %v432_v2 = vmax.f32 %v367_v59, %v1001_v12  ;;  %v433_v3 = vmax.f32 %v368_v60, %v1001_v12  ;;  %v308_v4 = vmul.f32 %v993_v6, %v243_v56 }
  0x74   : > { %557 = vst [vmem:[%s1040_s15 + $0x1a8] sm:$0xff] %v493_v45  ;;  %v434_v5 = vmax.f32 %v369_v61, %v1001_v12  ;;  %v435_v7 = vmax.f32 %v370_v62, %v1001_v12  ;;  %v436_v9 = vmax.f32 %v371_v63, %v1001_v12  ;;  %v372_v10 = vadd.f32 %v996_v8, %v307_v0 }
  0x75   : > { %558 = vst [vmem:[%s1040_s15 + $0x1b0] sm:$0xff] %v494_v52  ;;  %v496_v11 = vmin.f32 %v431_v1, %v1008_v18  ;;  %v497_v13 = vmin.f32 %v432_v2, %v1008_v18  ;;  %v498_v6 = vmin.f32 %v433_v3, %v1008_v18  ;;  %v373_v14 = vadd.f32 %v996_v8, %v308_v4 }
  0x76   : > { %559 = vst [vmem:[%s1040_s15 + $0x1b8] sm:$0xff] %v495_v57  ;;  %v499_v15 = vmin.f32 %v434_v5, %v1008_v18  ;;  %v437_v16 = vmax.f32 %v372_v10, %v1001_v12  ;;  %v500_v17 = vmin.f32 %v435_v7, %v1008_v18  ;;  %v501_v8 = vmin.f32 %v436_v9, %v1008_v18 }
  0x77   : > { %560 = vst [vmem:[%s1040_s15 + $0x1c0] sm:$0xff] %v496_v11  ;;  %v438_v19 = vmax.f32 %v373_v14, %v1001_v12 }
  0x78   : > { %561 = vst [vmem:[%s1040_s15 + $0x1c8] sm:$0xff] %v497_v13  ;;  %v502_v20 = vmin.f32 %v437_v16, %v1008_v18 }
  0x79   : > { %562 = vst [vmem:[%s1040_s15 + $0x1d0] sm:$0xff] %v498_v6  ;;  %v503_v21 = vmin.f32 %v438_v19, %v1008_v18 }
  0x7a   : > { %563 = vst [vmem:[%s1040_s15 + $0x1d8] sm:$0xff] %v499_v15 }
  0x7b   : > { %564 = vst [vmem:[%s1040_s15 + $0x1e0] sm:$0xff] %v500_v17 }
  0x7c   : > { %565 = vst [vmem:[%s1040_s15 + $0x1e8] sm:$0xff] %v501_v8 }
  0x7d   : > { %566 = vst [vmem:[%s1040_s15 + $0x1f0] sm:$0xff] %v502_v20 }
  0x7e   : > { %567 = vst [vmem:[%s1040_s15 + $0x1f8] sm:$0xff] %v503_v21 }
  0x7f   : > { %817 = shalt.err (!%p814_p11)
}
  0x80   : > { %694 = dma.vmem_to_hbm [thread:$0]  (%p944_p3), %s583_s17, 8192, %s585_s18, %s569_s19  }
  0x81 PF: > { %s596_s27 = sand.u32 1, %s848_s9   ;;  %p1425_p12 = scmp.ge.s32.totalorder %s860_s12, 2 }
  0x82   : > { %s597_s20 = scalar_lea.sflag [#allocation4], %s596_s27 }
  0x83   : > { %p705_p13 = pnand %p1425_p12, %p913_p6 }
  0x85   : > { %p706_p0 = pneg %p705_p13 }
  0x87   : > { %843 = dma.done.wait (%p706_p0), %s597_s20, 8192  }
  0x88   : > { %845 = vsyncadd (%p706_p0), %s597_s20, 4294959104  ;;  %p16_p5 = scmp.ge.s32.totalorder %s929_s21, 4   ;;  %s1426_s9 = smov %s852_s10 }
  0x89   : > { %s1427_s10 = smov %s856_s11  ;;  %s1428_s11 = smov %s939_s25 }
  0x8a   : > { %s1429_s12 = smov %s929_s21  ;;  %18 = sbr.rel (!%p16_p5) target bundleno = 6 (0x6), region = 78 }
  0x8f   :  { %603 = vsyncpa [#allocation3], 1 }
  0x90   :  { %605 = vsyncpa [#allocation3 + $0x1], 1 }
  0x91   :  { %606 = vsyncpa [#allocation4], 1 }
  0x92   :  { %608 = vsyncpa [#allocation4 + $0x1], 1 }
  0x93   :  { %609 = vsyncpa [#allocation5], 1 }
  0x94   :  { %611 = vsyncpa [#allocation5 + $0x1], 1 }

</bundles_post_ra>
